<compile_context>
chip_gen: v7x
topology: tpu7x:2x2x1
jax: 0.10.0
libtpu: 0.0.40
codegen_flags: <defaults>
</compile_context>

<pallas_src>
import jax
import jax.numpy as jnp
from jax.experimental import pallas as pl
from jax.experimental.pallas import tpu as pltpu


# ---------------------------------------------------------------------------
# Pallas kernel: fused (conv1x1+BN)(g) + (conv1x1+BN)(s) -> ReLU -> conv1x1
# -> sigmoid -> multiply by s, over one (batch, pixel-tile) grid step.
# Refs (channels-on-sublane, pixels-on-lane):
#   g_ref : (1, Cg, T)    s_ref : (1, Cs, T)
#   wg    : (Co, Cg)      ws    : (Co, Cs)      wo : (Co, Co)
#   bgs   : (Co, 1)  (= bg + bs, BN folded)     bo : (Co, 1)
#   out   : (1, Co, T)
# ---------------------------------------------------------------------------
def attention_gate_kernel(g_ref, s_ref,
                          wg_ref, ws_ref, wo_ref,
                          bgs_ref, bo_ref,
                          out_ref):
    g = g_ref[0].astype(jnp.float32)            # (Cg, T)
    s = s_ref[0].astype(jnp.float32)            # (Cs, T)

    # Wg(g) + Ws(s) (1x1 convs with folded BN), single fused bias.
    zg = jnp.dot(wg_ref[...], g, preferred_element_type=jnp.float32)   # (Co, T)
    zs = jnp.dot(ws_ref[...], s, preferred_element_type=jnp.float32)   # (Co, T)
    a = jnp.maximum(zg + zs + bgs_ref[...], 0.0)                       # (Co, T)

    # output conv (1x1) + sigmoid
    zo = jnp.dot(wo_ref[...], a, preferred_element_type=jnp.float32) + bo_ref[...]
    att = jax.nn.sigmoid(zo)

    # gate: out * s   (requires out_c == in_c[1], as in the PyTorch module)
    out_ref[0] = (att * s).astype(out_ref.dtype)


def attention_gate_pallas(g_nchw, s_nchw, params, *, tile_hw=2048):
    """AttentionGate forward. Inputs/outputs are NCHW like PyTorch."""
    N, Cg, H, W = g_nchw.shape
    _, Cs, _, _ = s_nchw.shape
    Co = params["wo"].shape[0]
    assert Cs == Co, "out * s requires out_c == in_c[1] (as in the PyTorch module)"

    HW = H * W
    # Free reshapes (contiguous NCHW), no HBM transpose pass.
    g3d = g_nchw.reshape(N, Cg, HW)
    s3d = s_nchw.reshape(N, Cs, HW)

    # Lane tile: either the full H*W plane, or a multiple of 128; a cdiv grid
    # plus Pallas' block clipping handles any remainder (no shape asserts).
    if tile_hw >= HW:
        t = HW
    else:
        t = max(128, (tile_hw // 128) * 128)
    grid = (N, pl.cdiv(HW, t))

    wg, ws, wo = params["wg"], params["ws"], params["wo"]    # (Co,Cg),(Co,Cs),(Co,Co)
    bgs = params["bg"] + params["bs"]                        # fused ReLU-input bias (Co,1)
    bo = params["bo"]                                        # (Co,1)

    out3d = pl.pallas_call(
        attention_gate_kernel,
        out_shape=jax.ShapeDtypeStruct((N, Co, HW), s_nchw.dtype),
        grid_spec=pltpu.PrefetchScalarGridSpec(
            num_scalar_prefetch=0,
            grid=grid,
            in_specs=[
                pl.BlockSpec((1, Cg, t), lambda n, i: (n, 0, i)),   # g tile (lane-dense)
                pl.BlockSpec((1, Cs, t), lambda n, i: (n, 0, i)),   # s tile (lane-dense)
                pl.BlockSpec((Co, Cg), lambda n, i: (0, 0)),        # Wg (BN folded)
                pl.BlockSpec((Co, Cs), lambda n, i: (0, 0)),        # Ws (BN folded)
                pl.BlockSpec((Co, Co), lambda n, i: (0, 0)),        # Wo
                pl.BlockSpec((Co, 1), lambda n, i: (0, 0)),         # bg + bs (folded, fused)
                pl.BlockSpec((Co, 1), lambda n, i: (0, 0)),         # bo
            ],
            out_specs=pl.BlockSpec((1, Co, t), lambda n, i: (n, 0, i)),
        ),
        compiler_params=pltpu.CompilerParams(
            dimension_semantics=("parallel", "parallel")),
    )(g3d, s3d, wg, ws, wo, bgs, bo)

    # (N, Co, H*W) -> NCHW, free reshape.
    return out3d.reshape(N, Co, H, W)


# ---------------------------------------------------------------------------
# Parameter setup: deterministic init + BatchNorm (eval mode) folding.
# PyTorch conv weight is (Cout, Cin, 1, 1); we keep the (Cout, Cin) matmul form
# directly (matches the channels-on-sublane kernel layout).
# BN (inference): y = (z - mean)/sqrt(var+eps)*gamma + beta
#   folded: W' = W * scale, b' = b*scale + (beta - mean*scale)
# ---------------------------------------------------------------------------
def fold_bn(w_co_ci, b_co, gamma, beta, mean, var, eps=1e-5):
    scale = gamma / jnp.sqrt(var + eps)              # (Co,)
    w_f = w_co_ci * scale[:, None]                   # (Co, Ci)
    b_f = b_co * scale + (beta - mean * scale)       # (Co,)
    return w_f.astype(jnp.float32), b_f.reshape(-1, 1).astype(jnp.float32)


def make_params(key, in_c, out_c):
    kg, ks, ko, kbn = jax.random.split(key, 4)

    def conv_init(k, ci, co):
        kw, kb = jax.random.split(k)
        bound = 1.0 / jnp.sqrt(ci)
        w = jax.random.uniform(kw, (co, ci), jnp.float32, -bound, bound)
        b = jax.random.uniform(kb, (co,), jnp.float32, -bound, bound)
        return w, b

    wg_raw, bg_raw = conv_init(kg, in_c[0], out_c)
    ws_raw, bs_raw = conv_init(ks, in_c[1], out_c)
    wo_raw, bo_raw = conv_init(ko, out_c, out_c)

    # Deterministic non-trivial BN (eval-mode) statistics / affine params.
    # TODO(synk): training-mode BatchNorm (batch statistics) is not modeled;
    # this reproduces eval/inference semantics of nn.BatchNorm2d.
    k1, k2, k3, k4 = jax.random.split(kbn, 4)
    gamma_g = 1.0 + 0.1 * jax.random.normal(k1, (out_c,))
    beta_g = 0.1 * jax.random.normal(k2, (out_c,))
    mean_g = 0.05 * jax.random.normal(k3, (out_c,))
    var_g = 1.0 + 0.1 * jnp.abs(jax.random.normal(k4, (out_c,)))

    gamma_s = 1.0 - 0.05 * jnp.arange(out_c, dtype=jnp.float32) / max(out_c, 1)
    beta_s = 0.02 * jnp.arange(out_c, dtype=jnp.float32)
    mean_s = jnp.zeros((out_c,), jnp.float32)
    var_s = jnp.ones((out_c,), jnp.float32)

    wg, bg = fold_bn(wg_raw, bg_raw, gamma_g, beta_g, mean_g, var_g)
    ws, bs = fold_bn(ws_raw, bs_raw, gamma_s, beta_s, mean_s, var_s)

    return {
        "wg": wg, "bg": bg,
        "ws": ws, "bs": bs,
        "wo": wo_raw.astype(jnp.float32),
        "bo": bo_raw.reshape(-1, 1).astype(jnp.float32),
    }


# ---------------------------------------------------------------------------
# Plain-JAX reference (same math, same layout) for a correctness check.
# ---------------------------------------------------------------------------
def attention_gate_ref(g_nchw, s_nchw, p):
    N, Cg, H, W = g_nchw.shape
    Cs = s_nchw.shape[1]
    Co = p["wo"].shape[0]
    g = g_nchw.reshape(N, Cg, H * W).astype(jnp.float32)
    s = s_nchw.reshape(N, Cs, H * W).astype(jnp.float32)
    zg = jnp.einsum("oc,ncp->nop", p["wg"], g) + p["bg"][None]
    zs = jnp.einsum("oc,ncp->nop", p["ws"], s) + p["bs"][None]
    a = jnp.maximum(zg + zs, 0.0)
    zo = jnp.einsum("oc,ncp->nop", p["wo"], a) + p["bo"][None]
    att = jax.nn.sigmoid(zo)
    out = (att * s).astype(g_nchw.dtype)
    return out.reshape(N, Co, H, W)


if __name__ == "__main__":
    key = jax.random.PRNGKey(0)
    k_g, k_s, k_p = jax.random.split(key, 3)

    # Small shapes consistent with the module: in_c = (6, 4), out_c = 4.
    # g: gating signal (N, in_c[0], H, W); s: skip features (N, in_c[1], H, W).
    N, H, W = 2, 16, 16
    in_c, out_c = (6, 4), 4

    g = jax.random.normal(k_g, (N, in_c[0], H, W), jnp.float32)
    s = jax.random.normal(k_s, (N, in_c[1], H, W), jnp.float32)
    params = make_params(k_p, in_c, out_c)

    out = attention_gate_pallas(g, s, params)
    out = jax.block_until_ready(out)

    ref = attention_gate_ref(g, s, params)
    assert out.shape == (N, out_c, H, W)
    assert jnp.allclose(out, ref, atol=1e-5, rtol=1e-5), "mismatch vs reference"

    print("KERNEL_OK")
</pallas_src>

<mosaic_0001>
module attributes {stable_mosaic.version = 11 : i64} {
  func.func @attention_gate_kernel(%arg0: i32, %arg1: i32, %arg2: memref<1x6x256xf32, #tpu.memory_space<vmem>>, %arg3: memref<1x4x256xf32, #tpu.memory_space<vmem>>, %arg4: memref<4x6xf32, #tpu.memory_space<vmem>>, %arg5: memref<4x4xf32, #tpu.memory_space<vmem>>, %arg6: memref<4x4xf32, #tpu.memory_space<vmem>>, %arg7: memref<4x1xf32, #tpu.memory_space<vmem>>, %arg8: memref<4x1xf32, #tpu.memory_space<vmem>>, %arg9: memref<1x4x256xf32, #tpu.memory_space<vmem>>) attributes {dimension_semantics = [#tpu.dimension_semantics<parallel>, #tpu.dimension_semantics<parallel>], iteration_bounds = array<i64: 2, 1>, scalar_prefetch = 0 : i64, scratch_operands = 0 : i64, tpu.core_type = #tpu.core_type<tc>, window_params = [{transform_indices = @transform_0, window_bounds = array<i64: 1, 6, 256>}, {transform_indices = @transform_1, window_bounds = array<i64: 1, 4, 256>}, {pipeline_mode = #tpu.pipeline_mode<synchronous>, transform_indices = @transform_2, window_bounds = array<i64: 4, 6>}, {pipeline_mode = #tpu.pipeline_mode<synchronous>, transform_indices = @transform_3, window_bounds = array<i64: 4, 4>}, {pipeline_mode = #tpu.pipeline_mode<synchronous>, transform_indices = @transform_4, window_bounds = array<i64: 4, 4>}, {pipeline_mode = #tpu.pipeline_mode<synchronous>, transform_indices = @transform_5, window_bounds = array<i64: 4, 1>}, {pipeline_mode = #tpu.pipeline_mode<synchronous>, transform_indices = @transform_6, window_bounds = array<i64: 4, 1>}, {transform_indices = @transform_7, window_bounds = array<i64: 1, 4, 256>}]} {
    %c0 = arith.constant 0 : index
    %c0_0 = arith.constant 0 : index
    %c0_1 = arith.constant 0 : index
    %0 = vector.load %arg2[%c0, %c0_0, %c0_1] : memref<1x6x256xf32, #tpu.memory_space<vmem>>, vector<1x6x256xf32>
    %1 = vector.shape_cast %0 : vector<1x6x256xf32> to vector<6x256xf32>
    %c0_2 = arith.constant 0 : index
    %c0_3 = arith.constant 0 : index
    %c0_4 = arith.constant 0 : index
    %2 = vector.load %arg3[%c0_2, %c0_3, %c0_4] : memref<1x4x256xf32, #tpu.memory_space<vmem>>, vector<1x4x256xf32>
    %3 = vector.shape_cast %2 : vector<1x4x256xf32> to vector<4x256xf32>
    %c0_5 = arith.constant 0 : index
    %c0_6 = arith.constant 0 : index
    %4 = vector.load %arg4[%c0_5, %c0_6] : memref<4x6xf32, #tpu.memory_space<vmem>>, vector<4x6xf32>
    %cst = arith.constant dense<0.000000e+00> : vector<4x256xf32>
    %5 = tpu.matmul %4, %1, %cst {dimension_numbers = #tpu.dot_dimension_numbers<[1], [0], [0], [1], [0, 0, 1, 1], [], []>} : vector<4x6xf32>, vector<6x256xf32>, vector<4x256xf32> -> vector<4x256xf32>
    %c0_7 = arith.constant 0 : index
    %c0_8 = arith.constant 0 : index
    %6 = vector.load %arg5[%c0_7, %c0_8] : memref<4x4xf32, #tpu.memory_space<vmem>>, vector<4x4xf32>
    %cst_9 = arith.constant dense<0.000000e+00> : vector<4x256xf32>
    %7 = tpu.matmul %6, %3, %cst_9 {dimension_numbers = #tpu.dot_dimension_numbers<[1], [0], [0], [1], [0, 0, 1, 1], [], []>} : vector<4x4xf32>, vector<4x256xf32>, vector<4x256xf32> -> vector<4x256xf32>
    %8 = arith.addf %5, %7 : vector<4x256xf32>
    %c0_10 = arith.constant 0 : index
    %c0_11 = arith.constant 0 : index
    %9 = vector.load %arg7[%c0_10, %c0_11] : memref<4x1xf32, #tpu.memory_space<vmem>>, vector<4x1xf32>
    %10 = vector.broadcast %9 : vector<4x1xf32> to vector<4x256xf32>
    %11 = arith.addf %8, %10 : vector<4x256xf32>
    %cst_12 = arith.constant 0.000000e+00 : f32
    %12 = vector.broadcast %cst_12 : f32 to vector<4x256xf32>
    %13 = arith.maximumf %11, %12 : vector<4x256xf32>
    %c0_13 = arith.constant 0 : index
    %c0_14 = arith.constant 0 : index
    %14 = vector.load %arg6[%c0_13, %c0_14] : memref<4x4xf32, #tpu.memory_space<vmem>>, vector<4x4xf32>
    %cst_15 = arith.constant dense<0.000000e+00> : vector<4x256xf32>
    %15 = tpu.matmul %14, %13, %cst_15 {dimension_numbers = #tpu.dot_dimension_numbers<[1], [0], [0], [1], [0, 0, 1, 1], [], []>} : vector<4x4xf32>, vector<4x256xf32>, vector<4x256xf32> -> vector<4x256xf32>
    %c0_16 = arith.constant 0 : index
    %c0_17 = arith.constant 0 : index
    %16 = vector.load %arg8[%c0_16, %c0_17] : memref<4x1xf32, #tpu.memory_space<vmem>>, vector<4x1xf32>
    %17 = vector.broadcast %16 : vector<4x1xf32> to vector<4x256xf32>
    %18 = arith.addf %15, %17 : vector<4x256xf32>
    %19 = arith.negf %18 : vector<4x256xf32>
    %20 = math.exp %19 : vector<4x256xf32>
    %cst_18 = arith.constant 1.000000e+00 : f32
    %21 = vector.broadcast %cst_18 : f32 to vector<4x256xf32>
    %22 = arith.addf %21, %20 : vector<4x256xf32>
    %23 = arith.divf %21, %22 : vector<4x256xf32>
    %24 = arith.mulf %23, %3 : vector<4x256xf32>
    %c0_19 = arith.constant 0 : index
    %c0_20 = arith.constant 0 : index
    %c0_21 = arith.constant 0 : index
    %25 = vector.load %arg9[%c0_19, %c0_20, %c0_21] : memref<1x4x256xf32, #tpu.memory_space<vmem>>, vector<1x4x256xf32>
    %26 = vector.shape_cast %25 : vector<1x4x256xf32> to vector<4x256xf32>
    %27 = vector.shape_cast %24 : vector<4x256xf32> to vector<1x4x256xf32>
    tpu.vector_store %arg9[%c0_19, %c0_20, %c0_21], %27 {strides = array<i32>} : memref<1x4x256xf32, #tpu.memory_space<vmem>>, vector<1x4x256xf32>,
    return
  }
  func.func @transform_0(%arg0: i32, %arg1: i32) -> (i32, i32, i32) {
    %c0_i32 = arith.constant 0 : i32
    %c0_i32_0 = arith.constant 0 : i32
    return %arg0, %c0_i32, %arg1 : i32, i32, i32
  }
  func.func @transform_1(%arg0: i32, %arg1: i32) -> (i32, i32, i32) {
    %c0_i32 = arith.constant 0 : i32
    %c0_i32_0 = arith.constant 0 : i32
    return %arg0, %c0_i32, %arg1 : i32, i32, i32
  }
  func.func @transform_2(%arg0: i32, %arg1: i32) -> (i32, i32) {
    %c0_i32 = arith.constant 0 : i32
    %c0_i32_0 = arith.constant 0 : i32
    %c0_i32_1 = arith.constant 0 : i32
    return %c0_i32, %c0_i32_0 : i32, i32
  }
  func.func @transform_3(%arg0: i32, %arg1: i32) -> (i32, i32) {
    %c0_i32 = arith.constant 0 : i32
    %c0_i32_0 = arith.constant 0 : i32
    %c0_i32_1 = arith.constant 0 : i32
    return %c0_i32, %c0_i32_0 : i32, i32
  }
  func.func @transform_4(%arg0: i32, %arg1: i32) -> (i32, i32) {
    %c0_i32 = arith.constant 0 : i32
    %c0_i32_0 = arith.constant 0 : i32
    %c0_i32_1 = arith.constant 0 : i32
    return %c0_i32, %c0_i32_0 : i32, i32
  }
  func.func @transform_5(%arg0: i32, %arg1: i32) -> (i32, i32) {
    %c0_i32 = arith.constant 0 : i32
    %c0_i32_0 = arith.constant 0 : i32
    %c0_i32_1 = arith.constant 0 : i32
    return %c0_i32, %c0_i32_0 : i32, i32
  }
  func.func @transform_6(%arg0: i32, %arg1: i32) -> (i32, i32) {
    %c0_i32 = arith.constant 0 : i32
    %c0_i32_0 = arith.constant 0 : i32
    %c0_i32_1 = arith.constant 0 : i32
    return %c0_i32, %c0_i32_0 : i32, i32
  }
  func.func @transform_7(%arg0: i32, %arg1: i32) -> (i32, i32, i32) {
    %c0_i32 = arith.constant 0 : i32
    %c0_i32_0 = arith.constant 0 : i32
    return %arg0, %c0_i32, %arg1 : i32, i32, i32
  }
}

</mosaic_0001>

<bundles_post_ra>
// kernel: tpu_custom_call.1
= control target key start
LH: loop header
LB: loop body
LE: loop exit
PB: predicated region body
PF: predicated region fallthrough
CT: control target
= control target key end

     0   :  { %12 = vsyncpa [#allocation3], 0  ;;  %s1098_s0 = inlined_call_operand.vmem [shape: f32[2,6,256], index: 0, kind: input, shape index: {}]   ;;  %s1099_s1 = inlined_call_operand.vmem [shape: f32[2,4,256], index: 1, kind: input, shape index: {}]   ;;  %s1100_s2 = inlined_call_operand.vmem [shape: f32[4,6], index: 2, kind: input, shape index: {}]   ;;  %s1101_s3 = inlined_call_operand.vmem [shape: f32[4,4], index: 3, kind: input, shape index: {}]   ;;  %s1102_s4 = inlined_call_operand.vmem [shape: f32[4,4], index: 4, kind: input, shape index: {}]   ;;  %s1103_s5 = inlined_call_operand.vmem [shape: f32[4,1], index: 5, kind: input, shape index: {}]   ;;  %s1104_s6 = inlined_call_operand.vmem [shape: f32[4,1], index: 6, kind: input, shape index: {}]   ;;  %s1105_s7 = inlined_call_operand.hbm [shape: f32[2,4,256], index: 7, kind: output, shape index: {}]  }
   0x1   :  { %14 = vsyncpa [#allocation3 + $0x1], 0  ;;  %s962_s24 = smov 0   ;;  %s964_s25 = smov 0  }
   0x2   :  { %s966_s26 = smov 0   ;;  %s968_s27 = smov 0  }
   0x3   :  { %s970_s28 = smov 0   ;;  %s972_s29 = smov 0  }
   0x4 LB: > { %s741_s30 = sadd.s32 4294967295, %s917_s29   ;;  %s742_s8 = sadd.s32 4294967294, %s917_s29   ;;  %s917_s29 = sphi %s972_s29, %s20_s29   ;;  %s913_s28 = sphi %s970_s28, %s1112_s28   ;;  %s909_s27 = sphi %s968_s27, %s1111_s27   ;;  %s905_s26 = sphi %s966_s26, %s1110_s26   ;;  %s901_s25 = sphi %s964_s25, %s1109_s25   ;;  %s897_s24 = sphi %s962_s24, %s1108_s24  }
   0x5   : > { %s32_s9 = sadd.s32 1, %s913_s28  ;;  %s202_s10 = sadd.s32 1, %s905_s26 }
   0x6   : > { %p34_p0 = scmp.ge.s32.totalorder %s32_s9, 2  ;;  %p212_p1 = scmp.ne.s32.totalorder %s905_s26, %s901_s25 }
   0x7   : > { %p213_p2 = scmp.eq.s32.totalorder %s741_s30, 1  ;;  %p218_p3 = scmp.ne.s32.totalorder %s901_s25, %s897_s24 }
   0x8   : > { %s1114_s9 = smov (%p34_p0, %s32_s9), 0  ;;  %p219_p5 = scmp.eq.s32.totalorder %s742_s8, 1 }
   0x9   : > { %p1002_p4 = por %p213_p2, %p212_p1  ;;  %s197_s12 = ssub.s32 %s913_s28, %s1114_s9 }
   0xa   : > { %p745_p6 = scmp.ge.s32.totalorder %s917_s29, 1  ;;  %p200_p7 = scmp.eq.s32.totalorder %s197_s12, 0 }
   0xb   : > { %p1009_p8 = por %p219_p5, %p218_p3  ;;  %p278_p9 = scmp.lt.s32.totalorder %s917_s29, 3 }
   0xc   : > { %s1015_s14 = scalar_select %p200_p7, %s905_s26, %s202_s10  }
   0xd   : > { %p279_p10 = pnand %p745_p6, %p278_p9 }
   0xe   : > { %p324_p11 = scmp.lt.s32.totalorder (!%p279_p10), %s909_s27, 1  ;;  %v919_v0 = vmov (!%p279_p10), 0.0   ;;  %v920_v1 = vmov (!%p279_p10), 0   ;;  %v513_v2 = vld [vmem:[%s1103_s5] sm:$0xf] (!%p279_p10)  ;;  %vm355_vm0 = vcmask (!%p279_p10), 1043456  }
   0xf   : > { %282 = sbr.rel (%p279_p10) target bundleno = 517 (0x205), region = 48  ;;  %424 = vmatprep.mubr.f32.mxu0 (!%p279_p10), %v919_v0  ;;  %603 = vmatprep.mubr.f32.mxu1 (!%p279_p10), %v919_v0  ;;  %v524_v3 = vld [vmem:[%s1104_s6] sm:$0xf] (!%p279_p10)  ;;  %vm351_vm1 = vcmask (!%p279_p10), 31744   ;;  %vm435_vm2 = vcmask (!%p279_p10), 1045504   ;;  %vm431_vm3 = vcmask (!%p279_p10), 48128  }
  0x10   : > { %829 = vset.pattern.permute.xlu0 (!%p279_p10), %v920_v1  ;;  %v348_v6 = vld [vmem:[%s1101_s3] sm:$0xf] (!%p279_p10)  ;;  %s320_s21 = sand.u32 (!%p279_p10), 1, %s901_s25   ;;  %s769_s23 = sshll.u32 (!%p279_p10), %s909_s27, 7 }
  0x11   : > { %516 = vperm.xlu0 (!%p279_p10), %829, %v513_v2   ;;  %v347_v9 = vld [vmem:[%s1100_s2] sm:$0xf] (!%p279_p10)  ;;  %s746_s22 = sshll.u32 (!%p279_p10), %s320_s21, 3  ;;  %s1051_s16 = scalar_lea.hbm (!%p279_p10), %s1105_s7, %s769_s23 }
  0x12   : > { %v523_v17 = vld [vmem:[%s1102_s4] sm:$0xf] (!%p279_p10)  ;;  %s631_s17 = scalar_lea.sflag (!%p279_p10), [#allocation3], %s320_s21 }
  0x15   : > { %527 = vperm.xlu0 (!%p279_p10), %829, %v524_v3  }
  0x16   : > { %s325_s15 = scalar_select %p324_p11, %s909_s27, 1 }
  0x17   : > { %s921_s27 = smov [#allocation2]  }
  0x18   : > { %s768_s18 = sshll.u32 %s325_s15, 3  ;;  %s767_s19 = sshll.u32 %s325_s15, 4 }
  0x19   : > { %s341_s30 = scalar_lea.vmem %s1099_s1, %s768_s18  ;;  %s331_s12 = scalar_lea.vmem %s1098_s0, %s767_s19 }
  0x1a   : > { %v346_v4 = vld [vmem:[%s341_s30] sm:$0xff]  ;;  %v345_v7 = vld [vmem:[%s331_s12 + $0x8] sm:$0x3f]  ;;  %s322_s30 = scalar_lea.vmem [#allocation2], %s746_s22  ;;  %s843_s18 = sshll.u32 %s921_s27, 4  ;;  %s844_s18 = int_to_ptr.vmem [resolvable:$false] %s843_s18 }
  0x1b   : > { %v350_v5 = vcombine.high %v346_v4, %v346_v4  ;;  %v344_v8 = vld [vmem:[%s331_s12] sm:$0x3f]  ;;  %s647_s8 = sshll.u32 %s322_s30, 4  ;;  %s845_s19 = scalar_lea.vmem %s844_s18, 256  ;;  %s1053_s8 = int_to_ptr.vmem [resolvable:$true] %s647_s8 }
  0x1c   : > { %s839_s15 = scalar_lea.vmem %s1053_s8, 128  ;;  %p846_p1 = scmp.lt.s32.totalorder %s1053_s8, %s844_s18 }
  0x1d   : > { %751 = vmatprep.subr.msk.mxu0 %vm355_vm0, %v350_v5  ;;  %p840_p12 = scmp.ne.s32.totalorder %s1053_s8, %s839_s15  ;;  %p847_p2 = scmp.lt.s32.totalorder %s845_s19, %s839_s15 }
  0x1e   : > { %752 = vmatpush1.msk.msra.mxu0 %vm355_vm0, %v346_v4 }
  0x1f   : > { %753 = vmatmul.mubr.msk.f32.vlgmr.msra.gmra.mrb[0].mxu0 %vm351_vm1, %v348_v6  ;;  %754 = vmatprep.subr.msk.mxu0 %vm435_vm2, %v345_v7  ;;  %p841_p13 = pnand %p840_p12, %p1002_p4  ;;  %p848_p3 = por %p847_p2, %p846_p1 }
  0x20   : > { %755 = vmatpush1.msk.msra.mxu0 %vm435_vm2, %v344_v8  ;;  %506 = vmatprep.mubr.f32.mxu0 %v919_v0 }
  0x21   : > { %p842_p0 = pneg %p841_p13 }
  0x23   : > { %p849_p5 = pnand %p848_p3, %p842_p0 }
  0x27   : > { %756 = vmatmul.mubr.msk.f32.vlgmr.msra.gmra.mrb[0].mxu0 %vm431_vm3, %v347_v9 }
  0x90   : > { %v517_v10 = vpop.permute.xlu0 %516 }
  0x94   : > { %v528_v18 = vpop.permute.xlu0 %527 }
  0xfa   : > { %v508_v11 = vpop.f32.mrb[0].mxu0 }
  0xfb   : > { %v519_v12 = vadd.f32 %v517_v10, %v508_v11  ;;  %v510_v13 = vpop.f32.mrb[1].mxu0 }
  0xfc   : > { %v520_v14 = vadd.f32 %v517_v10, %v510_v13 }
  0xfd   : > { %v521_v16 = vmax.f32 %v519_v12, 0.0 }
  0xfe   : > { %v522_v15 = vmax.f32 %v520_v14, 0.0 }
 0x100   : > { %757 = vmatprep.subr.msk.mxu1 %vm355_vm0, %v522_v15 }
 0x101   : > { %758 = vmatpush1.msk.msra.mxu1 %vm355_vm0, %v521_v16 }
 0x102   : > { %759 = vmatmul.mubr.msk.f32.vlgmr.msra.gmra.mrb[0].mxu1 %vm351_vm1, %v523_v17 }
 0x1d5   : > { %v605_v19 = vpop.f32.mrb[0].mxu1 }
 0x1d6   : > { %v606_v20 = vadd.f32 %v605_v19, %v528_v18  ;;  %v607_v21 = vpop.f32.mrb[1].mxu1 }
 0x1d7   : > { %v608_v22 = vadd.f32 %v607_v21, %v528_v18 }
 0x1d8   : > { %v760_v23 = vmul.f32 -1.442695, %v606_v20 }
 0x1d9   : > { %v761_v24 = vmul.f32 -1.442695, %v608_v22 }
 0x1da   : > { %831 = vpow2.f32 %v760_v23 }
 0x1db   : > { %833 = vpow2.f32 %v761_v24 }
 0x1e4   : > { %v832_v25 = vpop.eup %831 }
 0x1e5   : > { %v834_v26 = vpop.eup %833  ;;  %v616_v27 = vadd.f32 1.0, %v832_v25 }
 0x1e6   : > { %v617_v28 = vadd.f32 1.0, %v834_v26 }
 0x1e7   : > { %835 = vrcp.f32 %v616_v27 }
 0x1e8   : > { %837 = vrcp.f32 %v617_v28 }
 0x1f1   : > { %v836_v29 = vpop.eup %835 }
 0x1f2   : > { %v838_v30 = vpop.eup %837  ;;  %v623_v31 = vmul.f32 %v836_v29, %v346_v4 }
 0x1f3   : > { %v624_v32 = vmul.f32 %v838_v30, %v350_v5 }
 0x1f5   : > { %v627_v33 = vcombine.low %v623_v31, %v624_v32 }
 0x1f7   : > { %629 = vst [vmem:[%s322_s30] sm:$0xff] %v627_v33 }
 0x1f8   : > { %852 = shalt.err (!%p849_p5)
}
 0x1f9   : > { %s853_s20 = scalar_lea.hbm %s1051_s16, 128  ;;  %s857_s23 = scalar_lea.hbm %s1105_s7, 256 }
 0x1fa   : > { %p854_p6 = scmp.ne.s32.totalorder %s1051_s16, %s853_s20  ;;  %p858_p10 = scmp.lt.u32.totalorder %s1051_s16, %s1105_s7 }
 0x1fb   : > { %p859_p11 = scmp.lt.u32.totalorder %s857_s23, %s853_s20  ;;  %p861_p13 = scmp.lt.u32.totalorder %s853_s20, %s1051_s16 }
 0x1fc   : > { %p855_p7 = pnand %p854_p6, %p1002_p4 }
 0x1fd   : > { %p860_p12 = por %p859_p11, %p858_p10 }
 0x1fe   : > { %p856_p9 = pneg %p855_p7 }
 0x1ff   : > { %p862_p0 = por %p861_p13, %p860_p12 }
 0x201   : > { %p863_p1 = pnand %p862_p0, %p856_p9 }
 0x203   : > { %866 = shalt.err (!%p863_p1)
}
 0x204   : > { %772 = dma.vmem_to_hbm [thread:$0]  (%p1002_p4), %s1053_s8, 128, %s1051_s16, %s631_s17  }
 0x205 PF: > { %p778_p2 = scmp.ge.s32.totalorder %s917_s29, 2  ;;  %s659_s12 = sand.u32 1, %s897_s24  }
 0x206   : > { %s660_s15 = scalar_lea.sflag [#allocation3], %s659_s12 }
 0x207   : > { %p775_p3 = pnand %p778_p2, %p1009_p8 }
 0x209   : > { %892 = dma.done.wait (!%p775_p3), %s660_s15, 128  }
 0x20a   : > { %894 = vsyncadd (!%p775_p3), %s660_s15, 4294967168  ;;  %s20_s29 = sadd.s32 1, %s917_s29   ;;  %s1108_s24 = smov %s901_s25 }
 0x20b   : > { %p17_p5 = scmp.ge.s32.totalorder %s20_s29, 4   ;;  %s1109_s25 = smov %s905_s26 }
 0x20c   : > { %s1110_s26 = smov %s1015_s14  ;;  %s1111_s27 = smov %s913_s28 }
 0x20d   : > { %s1112_s28 = smov %s1114_s9  ;;  %19 = sbr.rel (!%p17_p5) target bundleno = 4 (0x4), region = 86 }
 0x214   :  { %665 = vsyncpa [#allocation3], 1 }
 0x215   :  { %667 = vsyncpa [#allocation3 + $0x1], 1 }

</bundles_post_ra>
